<compile_context>
chip_gen: v6e
topology: v6e:2x2x1
jax: 0.10.0
libtpu: 0.0.40
codegen_flags: <defaults>
</compile_context>

<pallas_src>
import jax
import jax.numpy as jnp
from jax.experimental import pallas as pl
from jax.experimental.pallas import tpu as pltpu

_MIB = 1 << 20


def _identity_kernel(x_ref, o_ref):
    # Straight VMEM load -> store of the current tile.
    o_ref[...] = x_ref[...]


def _native_row_multiple(itemsize: int) -> int:
    """Dtype-native sublane row multiple: 8 (f32), 16 (bf16), 32 (int8/fp8)."""
    return 8 * max(1, 4 // max(1, itemsize))


def _pick_lane_width(total: int) -> int | None:
    """Widest lane dim (multiple of 128) dividing `total`, preferring >=8 rows."""
    cands = (8192, 4096, 2048, 1024, 512, 256, 128)
    for cand in cands:
        if total % cand == 0 and total // cand >= 8:
            return cand
    if total % 128 == 0:
        # Fewer than 8 rows remain; still lane-dense with a full-extent row dim.
        for cand in cands:
            if total % cand == 0:
                return cand
    return None


def _target_tile_bytes() -> int:
    """Per-tile byte budget, gated by generation (VMEM capacity)."""
    try:
        vmem = pltpu.get_tpu_info().vmem_capacity_bytes
    except Exception:
        vmem = None
    if vmem is not None and vmem <= 64 * _MIB:
        return 4 * _MIB   # v7x-class: 64 MiB VMEM -> keep 4x double-buffered << budget
    return 6 * _MIB       # v5e/v6e: 128 MiB VMEM -> bigger tiles amortize step overhead


def _pick_tile_rows(rows: int, lane: int, itemsize: int,
                    target_bytes: int, row_multiple: int) -> int:
    """Tile row count: multiple of the native sublane count, ~<= target_bytes."""
    if rows <= row_multiple:
        return rows  # full-extent block is always legal
    by_bytes = max(row_multiple, target_bytes // max(1, lane * itemsize))
    t = min(rows, by_bytes)
    t = (t // row_multiple) * row_multiple
    return max(t, row_multiple)


def maskrcnn_forward(x: jax.Array, *, materialize: bool = False) -> jax.Array:
    """Pallas 'forward' for the stub MaskRCNN module.

    Default path: identity pass-through of `x` with zero HBM traffic (the
    reference forward has no compute).  `materialize=True` forces a tiled,
    pipelined Pallas copy kernel instead (used for the self-test below).
    """
    if not materialize:
        return x

    # Degenerate shapes: nothing meaningful to copy through a kernel.
    if x.ndim == 0 or x.size == 0:
        return x

    orig_shape = x.shape
    total = x.size
    itemsize = jnp.dtype(x.dtype).itemsize
    row_mult = _native_row_multiple(itemsize)

    lane = _pick_lane_width(total)
    if lane is None:
        # Lane-unfriendly total: avoid the masked-store (vst.msk) path entirely
        # by using a 1-D full-extent block (single grid step).
        # TODO(synk): segment/pad for huge lane-unfriendly inputs if ever needed.
        flat = x.reshape(total)
        out = pl.pallas_call(
            _identity_kernel,
            out_shape=jax.ShapeDtypeStruct((total,), x.dtype),
        )(flat)
        return out.reshape(orig_shape)

    rows = total // lane
    x2d = x.reshape(rows, lane)

    tile_r = _pick_tile_rows(rows, lane, itemsize, _target_tile_bytes(), row_mult)
    tile_bytes = tile_r * lane * itemsize
    grid = (pl.cdiv(rows, tile_r),)

    out2d = pl.pallas_call(
        _identity_kernel,
        out_shape=jax.ShapeDtypeStruct((rows, lane), x2d.dtype),
        grid=grid,
        in_specs=[pl.BlockSpec((tile_r, lane), lambda i: (i, 0))],
        out_specs=pl.BlockSpec((tile_r, lane), lambda i: (i, 0)),
        compiler_params=pltpu.CompilerParams(
            dimension_semantics=("parallel",),
            # Cover in+out double-buffering with headroom; safe on all gens
            # (<= 48 MiB, under v7x's 64 MiB physical VMEM).
            vmem_limit_bytes=min(48 * _MIB, max(32 * _MIB, 6 * tile_bytes)),
        ),
        cost_estimate=pl.CostEstimate(
            flops=0,
            transcendentals=0,
            bytes_accessed=2 * total * itemsize,
        ),
    )(x2d)

    return out2d.reshape(orig_shape)


if __name__ == "__main__":
    key = jax.random.PRNGKey(0)
    # Small NCHW input consistent with a detection-backbone style module.
    x = jax.random.normal(key, (2, 4, 16, 16), dtype=jnp.float32)

    # Fast path (matches the stub's "no compute" semantics as closely as a
    # runnable TPU function can): returns x with zero kernel overhead.
    y_fast = maskrcnn_forward(x)
    jax.block_until_ready(y_fast)
    assert y_fast.shape == x.shape

    # Kernel path: exercise the tiled Pallas identity copy once.
    y = maskrcnn_forward(x, materialize=True)
    jax.block_until_ready(y)

    assert y.shape == x.shape
    assert bool(jnp.allclose(y, x))
    assert bool(jnp.allclose(y_fast, x))

    print("KERNEL_OK")
</pallas_src>

<mosaic_0001>
module attributes {stable_mosaic.version = 11 : i64} {
  func.func @_identity_kernel(%arg0: i32, %arg1: memref<8x256xf32, #tpu.memory_space<vmem>>, %arg2: memref<8x256xf32, #tpu.memory_space<vmem>>) attributes {dimension_semantics = [#tpu.dimension_semantics<parallel>], iteration_bounds = array<i64: 1>, scalar_prefetch = 0 : i64, scratch_operands = 0 : i64, tpu.core_type = #tpu.core_type<tc>, window_params = [{transform_indices = @transform_0, window_bounds = array<i64: 8, 256>}, {transform_indices = @transform_1, window_bounds = array<i64: 8, 256>}]} {
    %c0 = arith.constant 0 : index
    %c0_0 = arith.constant 0 : index
    %0 = vector.load %arg1[%c0, %c0_0] : memref<8x256xf32, #tpu.memory_space<vmem>>, vector<8x256xf32>
    %c0_1 = arith.constant 0 : index
    %c0_2 = arith.constant 0 : index
    %1 = vector.load %arg2[%c0_1, %c0_2] : memref<8x256xf32, #tpu.memory_space<vmem>>, vector<8x256xf32>
    tpu.vector_store %arg2[%c0_1, %c0_2], %0 {strides = array<i32>} : memref<8x256xf32, #tpu.memory_space<vmem>>, vector<8x256xf32>,
    return
  }
  func.func @transform_0(%arg0: i32) -> (i32, i32) {
    %c0_i32 = arith.constant 0 : i32
    %c0_i32_0 = arith.constant 0 : i32
    return %arg0, %c0_i32 : i32, i32
  }
  func.func @transform_1(%arg0: i32) -> (i32, i32) {
    %c0_i32 = arith.constant 0 : i32
    %c0_i32_0 = arith.constant 0 : i32
    return %arg0, %c0_i32 : i32, i32
  }
}

</mosaic_0001>

<bundles_post_ra>
// kernel: tpu_custom_call.1
= control target key start
LH: loop header
LB: loop body
LE: loop exit
PB: predicated region body
PF: predicated region fallthrough
CT: control target
= control target key end

     0   :  { %6 = vsyncpa [#allocation3], 0  ;;  %s104_s0 = inlined_call_operand.hbm [shape: f32[8,256], index: 0, kind: input, shape index: {}]   ;;  %s105_s1 = inlined_call_operand.hbm [shape: f32[8,256], index: 1, kind: output, shape index: {}]  }
   0x1   :  { %7 = vsyncpa [#allocation4], 0  ;;  %s86_s6 = smov [#allocation2]  }
   0x2   :  { %s14_s7 = sshll.u32 %s86_s6, 4  ;;  %s15_s7 = int_to_ptr.vmem [resolvable:$true] %s14_s7 }
   0x3   :  { %s50_s8 = scalar_lea.vmem %s15_s7, 256  ;;  %p55_p1 = scmp.lt.s32.totalorder %s15_s7, %s15_s7 }
   0x4   :  { %p51_p0 = scmp.ne.s32.totalorder %s15_s7, %s50_s8  ;;  %p56_p2 = scmp.lt.s32.totalorder %s50_s8, %s50_s8 }
   0x6   :  { %p57_p3 = por %p56_p2, %p55_p1 }
   0x8   :  { %p58_p4 = pnand %p57_p3, %p51_p0 }
   0xa   :  { %61 = shalt.err (!%p58_p4)
}
   0xb   :  { %17 = dma.hbm_to_vmem [thread:$0]  %s104_s0, 256, %s15_s7, [#allocation3]  }
   0xc   :  { %82 = dma.done.wait [#allocation3], 256  }
   0xd   :  { %83 = vsyncadd [#allocation3], 4294967040  ;;  %s87_s11 = smov [#allocation5]   ;;  %v21_v0 = vld [vmem:[#allocation2] sm:$0xff]  ;;  %v22_v1 = vld [vmem:[#allocation2 + $0x8] sm:$0xff] }
   0xe   :  { %s31_s12 = sshll.u32 %s87_s11, 4  ;;  %23 = vst [vmem:[#allocation5] sm:$0xff] %v21_v0  ;;  %24 = vst [vmem:[#allocation5 + $0x8] sm:$0xff] %v22_v1  ;;  %s32_s12 = int_to_ptr.vmem [resolvable:$true] %s31_s12 }
   0xf   :  { %s62_s13 = scalar_lea.vmem %s32_s12, 256  ;;  %p67_p6 = scmp.lt.s32.totalorder %s32_s12, %s32_s12 }
  0x10   :  { %p63_p5 = scmp.ne.s32.totalorder %s32_s12, %s62_s13  ;;  %p68_p7 = scmp.lt.s32.totalorder %s62_s13, %s62_s13 }
  0x12   :  { %p69_p8 = por %p68_p7, %p67_p6 }
  0x14   :  { %p70_p9 = pnand %p69_p8, %p63_p5 }
  0x16   :  { %73 = shalt.err (!%p70_p9)
}
  0x17   :  { %34 = dma.vmem_to_hbm [thread:$0]  %s32_s12, 256, %s105_s1, [#allocation4]  }
  0x18   :  { %84 = dma.done.wait [#allocation4], 256  }
  0x19   :  { %85 = vsyncadd [#allocation4], 4294967040 }
  0x1a   :  { %38 = vsyncpa [#allocation3], 1 }
  0x1b   :  { %39 = vsyncpa [#allocation4], 1 }

</bundles_post_ra>
